<compile_context>
chip_gen: v6e
topology: v6e:2x2x1
jax: 0.10.0
libtpu: 0.0.40
codegen_flags: <defaults>
</compile_context>

<pallas_src>
import functools
from typing import NamedTuple

import jax
import jax.numpy as jnp
from jax.experimental import pallas as pl
from jax.experimental.pallas import tpu as pltpu

_MIB = 1024 * 1024


def _round_up(x, m):
    return ((x + m - 1) // m) * m


def _cdiv(a, b):
    return -(-a // b)


def _vmem_capacity_bytes():
    try:
        return int(pltpu.get_tpu_info().vmem_capacity_bytes)
    except Exception:
        return 64 * _MIB  # conservative fallback: v7x per-TensorCore VMEM


class _Meta(NamedTuple):
    DL: int
    DR: int
    DO: int
    dla: int
    dra: int
    k_pad: int
    do_pad: int
    k_tile: int
    do_tile: int
    vmem_cap: int
    act_dtype: str


def _bilinear_kernel(z_ref, w_ref, b_ref, out_ref):
    # Grid: (B tiles [parallel], DO tiles [parallel], K tiles [arbitrary, last]).
    k = pl.program_id(2)

    @pl.when(k == 0)
    def _init():  # fused (pre-summed) f32 bias
        out_ref[...] = jnp.broadcast_to(b_ref[...], out_ref.shape)

    # One MXU matmul per step; f32 accumulator resident across the reduction.
    out_ref[...] += jnp.dot(z_ref[...], w_ref[...],
                            preferred_element_type=jnp.float32)


def prepare_bilinear_params(params, *, do_tile_max=256, weight_block_bytes=None,
                            weight_dtype=jnp.bfloat16):
    """One-time weight reformatting. Cache the result; do NOT call per forward."""
    w_bi = jnp.asarray(params["w_bi"], jnp.float32)          # (DO, DL, DR)
    DO, DL, DR = w_bi.shape
    w_l = jnp.asarray(params["w_l"], jnp.float32)            # (DO, DL)
    w_r = jnp.asarray(params["w_r"], jnp.float32)            # (DO, DR)

    vmem_cap = _vmem_capacity_bytes()
    if weight_block_bytes is None:
        # 8 MiB blocks (16 MiB double-buffered) on 128-MiB VMEM chips (v5e/v6e),
        # 6 MiB on v7x (64 MiB physical).
        weight_block_bytes = 8 * _MIB if vmem_cap >= 128 * _MIB else 6 * _MIB

    itemsize = jnp.dtype(weight_dtype).itemsize
    dla, dra = DL + 1, DR + 1                                 # +1: constant-1 column
    K = dla * dra                                             # flat contraction length

    # --- DO tiling: lane-dense multiple of 128; keep >=2 blocks when possible
    # so the parallel axis can shard across v7x's two TensorCores.
    do_pad = _round_up(DO, 128)
    do_tile = max(128, (min(do_tile_max, do_pad) // 128) * 128)
    while do_tile > 128 and (do_pad % do_tile != 0 or do_pad // do_tile < 2):
        do_tile -= 128
    while do_tile > 128 and 128 * do_tile * itemsize > weight_block_bytes:
        do_tile -= 128                                        # never exceed the budget

    # --- K tiling: multiple of 128, sized so one weight block fits the budget,
    # spread near-uniformly so the padded tail is tiny.
    k_aligned = _round_up(K, 128)
    max_rows = max(128, ((weight_block_bytes // (do_tile * itemsize)) // 128) * 128)
    if k_aligned <= max_rows:
        k_tile = k_aligned
    else:
        n_k = _cdiv(k_aligned, max_rows)
        k_tile = _round_up(_cdiv(k_aligned, n_k), 128)
    k_pad = _round_up(k_aligned, k_tile)

    # --- Augmented weight, flattened row-major over (i, j): W_flat[i*dra+j, o].
    w_aug = jnp.zeros((dla, dra, DO), jnp.float32)
    w_aug = w_aug.at[:DL, :DR, :].set(jnp.transpose(w_bi, (1, 2, 0)))
    w_aug = w_aug.at[:DL, DR, :].set(w_l.T)                  # linear_l (xr ones col)
    w_aug = w_aug.at[DL, :DR, :].set(w_r.T)                  # linear_r (xl ones col)
    w_flat = w_aug.reshape(K, DO)
    w_flat = jnp.pad(w_flat, ((0, k_pad - K), (0, do_pad - DO))).astype(weight_dtype)

    b_total = (jnp.asarray(params["b_bi"]) + jnp.asarray(params["b_l"])
               + jnp.asarray(params["b_r"])).astype(jnp.float32)
    b_total = jnp.pad(b_total[None, :], ((0, 0), (0, do_pad - DO)))

    meta = _Meta(DL, DR, DO, dla, dra, k_pad, do_pad, k_tile, do_tile,
                 vmem_cap, jnp.dtype(weight_dtype).name)
    return {"w_flat": w_flat, "b_total": b_total, "meta": meta}


@functools.partial(jax.jit, static_argnames=("meta",))
def _bilinear_forward_impl(x_l, x_r, w_flat, b_total, meta):
    m = meta
    act_dtype = jnp.dtype(m.act_dtype)
    B = x_l.shape[0]

    # Batch tile: bf16 sublane quantum is 16 rows; bound the Z block in VMEM.
    b_tile = min(_round_up(B, 16), 256)
    while b_tile > 16 and b_tile * m.k_tile * 2 > 8 * _MIB:
        b_tile = max(16, _round_up(b_tile // 2, 16))
    b_pad = _round_up(B, b_tile)

    # Per-call glue fused into this single jitted function: ones column,
    # outer-product slab, padding, and the final un-pad slice.
    ones = jnp.ones((B, 1), act_dtype)
    xl_aug = jnp.concatenate([x_l.astype(act_dtype), ones], axis=1)   # (B, dla)
    xr_aug = jnp.concatenate([x_r.astype(act_dtype), ones], axis=1)   # (B, dra)
    z = (xl_aug[:, :, None] * xr_aug[:, None, :]).reshape(B, m.dla * m.dra)
    z = jnp.pad(z, ((0, b_pad - B), (0, m.k_pad - m.dla * m.dra)))

    n_b = b_pad // b_tile
    n_do = m.do_pad // m.do_tile
    n_k = m.k_pad // m.k_tile

    # VMEM budget: double-buffered Z + W blocks, resident f32 output block.
    w_blk = m.k_tile * m.do_tile * jnp.dtype(act_dtype).itemsize
    z_blk = b_tile * m.k_tile * jnp.dtype(act_dtype).itemsize
    out_blk = b_tile * m.do_tile * 4
    footprint = 2 * (w_blk + z_blk + out_blk) + 2 * m.do_tile * 4
    cap = 64 * _MIB if m.vmem_cap >= 128 * _MIB else 48 * _MIB
    vmem_limit = int(min(cap, max(32 * _MIB, 2 * footprint)))

    out = pl.pallas_call(
        _bilinear_kernel,
        out_shape=jax.ShapeDtypeStruct((b_pad, m.do_pad), jnp.float32),
        grid_spec=pltpu.PrefetchScalarGridSpec(
            num_scalar_prefetch=0,
            grid=(n_b, n_do, n_k),                            # reduction axis last
            in_specs=[
                pl.BlockSpec((b_tile, m.k_tile), lambda b, n, k: (b, k)),     # Z
                pl.BlockSpec((m.k_tile, m.do_tile), lambda b, n, k: (k, n)),  # W
                pl.BlockSpec((1, m.do_tile), lambda b, n, k: (0, n)),         # bias
            ],
            out_specs=pl.BlockSpec((b_tile, m.do_tile), lambda b, n, k: (b, n)),
        ),
        compiler_params=pltpu.CompilerParams(
            dimension_semantics=("parallel", "parallel", "arbitrary"),
            vmem_limit_bytes=vmem_limit,
        ),
    )(z, w_flat, b_total)

    return out[:B, :m.DO]


def bilinear_forward(x_l, x_r, prepared):
    """Pallas forward for the Bilinear module (use prepare_bilinear_params once)."""
    return _bilinear_forward_impl(x_l, x_r, prepared["w_flat"],
                                  prepared["b_total"], meta=prepared["meta"])


def init_params(key, dim_left, dim_right, dim_out):
    """Deterministic synthetic init (PyTorch-style uniform bounds)."""
    k = jax.random.split(key, 6)
    bound_bi = 1.0 / jnp.sqrt(dim_left)
    bound_l = 1.0 / jnp.sqrt(dim_left)
    bound_r = 1.0 / jnp.sqrt(dim_right)
    u = lambda kk, shape, b: jax.random.uniform(kk, shape, jnp.float32, -b, b)
    return {
        "w_bi": u(k[0], (dim_out, dim_left, dim_right), bound_bi),
        "b_bi": u(k[1], (dim_out,), bound_bi),
        "w_l": u(k[2], (dim_out, dim_left), bound_l),
        "b_l": u(k[3], (dim_out,), bound_l),
        "w_r": u(k[4], (dim_out, dim_right), bound_r),
        "b_r": u(k[5], (dim_out,), bound_r),
    }


def reference_forward(x_l, x_r, p):
    """Pure f32 reference of the PyTorch module."""
    bi = jnp.einsum("bi,oij,bj->bo", x_l, p["w_bi"], x_r) + p["b_bi"]
    lin = x_l @ p["w_l"].T + p["b_l"] + x_r @ p["w_r"].T + p["b_r"]
    return bi + lin


def reference_forward_bf16(x_l, x_r, p):
    """Reference with the same bf16 rounding the kernel uses (f32 accumulation)."""
    bf, f32 = jnp.bfloat16, jnp.float32
    xl, xr = x_l.astype(bf), x_r.astype(bf)
    wbi = p["w_bi"].astype(bf).astype(f32)
    wl = p["w_l"].astype(bf).astype(f32)
    wr = p["w_r"].astype(bf).astype(f32)
    z = (xl[:, :, None] * xr[:, None, :]).astype(f32)          # bf16-rounded products
    bi = jnp.einsum("bij,oij->bo", z, wbi)
    lin = xl.astype(f32) @ wl.T + xr.astype(f32) @ wr.T
    return bi + lin + (p["b_bi"] + p["b_l"] + p["b_r"])


if __name__ == "__main__":
    B, DIM_LEFT, DIM_RIGHT, DIM_OUT = 8, 32, 16, 8

    key = jax.random.PRNGKey(0)
    k_xl, k_xr, k_p = jax.random.split(key, 3)
    x_l = jax.random.normal(k_xl, (B, DIM_LEFT), jnp.float32)
    x_r = jax.random.normal(k_xr, (B, DIM_RIGHT), jnp.float32)
    params = init_params(k_p, DIM_LEFT, DIM_RIGHT, DIM_OUT)

    prepared = prepare_bilinear_params(params)   # one-time weight prep (cached)
    out = bilinear_forward(x_l, x_r, prepared)
    out = jax.block_until_ready(out)

    assert out.shape == (B, DIM_OUT)
    # Loose check vs full-f32 reference (kernel uses bf16 weights/activations).
    ref32 = reference_forward(x_l, x_r, params)
    assert jnp.allclose(out, ref32, atol=1e-1, rtol=2e-2), "mismatch vs f32 reference"
    # Tight check vs a reference with identical bf16 rounding + f32 accumulation.
    refbf = reference_forward_bf16(x_l, x_r, params)
    assert jnp.allclose(out, refbf, atol=1e-2, rtol=1e-2), "mismatch vs bf16 reference"

    print("KERNEL_OK")
</pallas_src>

<mosaic_0001>
module attributes {stable_mosaic.version = 11 : i64} {
  func.func @_bilinear_kernel(%arg0: i32, %arg1: i32, %arg2: i32, %arg3: memref<16x640xbf16, #tpu.memory_space<vmem>>, %arg4: memref<640x128xbf16, #tpu.memory_space<vmem>>, %arg5: memref<1x128xf32, #tpu.memory_space<vmem>>, %arg6: memref<16x128xf32, #tpu.memory_space<vmem>>) attributes {dimension_semantics = [#tpu.dimension_semantics<parallel>, #tpu.dimension_semantics<parallel>, #tpu.dimension_semantics<arbitrary>], iteration_bounds = array<i64: 1, 1, 1>, scalar_prefetch = 0 : i64, scratch_operands = 0 : i64, tpu.core_type = #tpu.core_type<tc>, window_params = [{transform_indices = @transform_0, window_bounds = array<i64: 16, 640>}, {transform_indices = @transform_1, window_bounds = array<i64: 640, 128>}, {transform_indices = @transform_2, window_bounds = array<i64: 1, 128>}, {transform_indices = @transform_3, window_bounds = array<i64: 16, 128>}]} {
    %c0_i32 = arith.constant 0 : i32
    %0 = arith.cmpi eq, %arg2, %c0_i32 : i32
    %1 = arith.extui %0 : i1 to i32
    %c0_i32_0 = arith.constant 0 : i32
    %2 = arith.cmpi ne, %1, %c0_i32_0 : i32
    scf.if %2 {
      %c0_8 = arith.constant 0 : index
      %c0_9 = arith.constant 0 : index
      %9 = vector.load %arg5[%c0_8, %c0_9] : memref<1x128xf32, #tpu.memory_space<vmem>>, vector<1x128xf32>
      %10 = vector.shape_cast %9 : vector<1x128xf32> to vector<1x128xf32>
      %11 = vector.broadcast %10 : vector<1x128xf32> to vector<16x128xf32>
      %c0_10 = arith.constant 0 : index
      %c0_11 = arith.constant 0 : index
      %12 = vector.load %arg6[%c0_10, %c0_11] : memref<16x128xf32, #tpu.memory_space<vmem>>, vector<16x128xf32>
      tpu.vector_store %arg6[%c0_10, %c0_11], %11 {strides = array<i32>} : memref<16x128xf32, #tpu.memory_space<vmem>>, vector<16x128xf32>,
    } else {
    }
    %c0 = arith.constant 0 : index
    %c0_1 = arith.constant 0 : index
    %3 = vector.load %arg6[%c0, %c0_1] : memref<16x128xf32, #tpu.memory_space<vmem>>, vector<16x128xf32>
    %c0_2 = arith.constant 0 : index
    %c0_3 = arith.constant 0 : index
    %4 = vector.load %arg3[%c0_2, %c0_3] : memref<16x640xbf16, #tpu.memory_space<vmem>>, vector<16x640xbf16>
    %c0_4 = arith.constant 0 : index
    %c0_5 = arith.constant 0 : index
    %5 = vector.load %arg4[%c0_4, %c0_5] : memref<640x128xbf16, #tpu.memory_space<vmem>>, vector<640x128xbf16>
    %cst = arith.constant dense<0.000000e+00> : vector<16x128xf32>
    %6 = tpu.matmul %4, %5, %cst {dimension_numbers = #tpu.dot_dimension_numbers<[1], [0], [0], [1], [0, 0, 1, 1], [], []>} : vector<16x640xbf16>, vector<640x128xbf16>, vector<16x128xf32> -> vector<16x128xf32>
    %7 = arith.addf %3, %6 : vector<16x128xf32>
    %c0_6 = arith.constant 0 : index
    %c0_7 = arith.constant 0 : index
    %8 = vector.load %arg6[%c0_6, %c0_7] : memref<16x128xf32, #tpu.memory_space<vmem>>, vector<16x128xf32>
    tpu.vector_store %arg6[%c0_6, %c0_7], %7 {strides = array<i32>} : memref<16x128xf32, #tpu.memory_space<vmem>>, vector<16x128xf32>,
    return
  }
  func.func @transform_0(%arg0: i32, %arg1: i32, %arg2: i32) -> (i32, i32) {
    %c0_i32 = arith.constant 0 : i32
    return %arg0, %arg2 : i32, i32
  }
  func.func @transform_1(%arg0: i32, %arg1: i32, %arg2: i32) -> (i32, i32) {
    %c0_i32 = arith.constant 0 : i32
    return %arg2, %arg1 : i32, i32
  }
  func.func @transform_2(%arg0: i32, %arg1: i32, %arg2: i32) -> (i32, i32) {
    %c0_i32 = arith.constant 0 : i32
    %c0_i32_0 = arith.constant 0 : i32
    return %c0_i32, %arg1 : i32, i32
  }
  func.func @transform_3(%arg0: i32, %arg1: i32, %arg2: i32) -> (i32, i32) {
    %c0_i32 = arith.constant 0 : i32
    return %arg0, %arg1 : i32, i32
  }
}

</mosaic_0001>

<bundles_post_ra>
// kernel: _bilinear_forward_impl.1
= control target key start
LH: loop header
LB: loop body
LE: loop exit
PB: predicated region body
PF: predicated region fallthrough
CT: control target
= control target key end

     0   :  { %v681_v34 = vmov 0.0   ;;  %vm682_vm0 = vmmov 0   ;;  %s847_s1 = inlined_call_operand.vmem [shape: bf16[640,128], index: 1, kind: input, shape index: {}]   ;;  %s848_s0 = inlined_call_operand.vmem [shape: bf16[16,640], index: 0, kind: input, shape index: {}]   ;;  %s849_s2 = inlined_call_operand.vmem [shape: f32[1,128], index: 2, kind: input, shape index: {}]   ;;  %s850_s3 = inlined_call_operand.vmem [shape: f32[16,128], index: 3, kind: output, shape index: {}]  }
   0x1   :  { %v634_v0 = vld [vmem:[%s847_s1 + $0x78] sm:$0xff]   ;;  %v638_v4 = vld [vmem:[%s847_s1 + $0x70] sm:$0xff]   ;;  %v642_v8 = vld [vmem:[%s847_s1 + $0x68] sm:$0xff]  }
   0x2   :  { %v635_v1 = vld [vmem:[%s847_s1 + $0xf8] sm:$0xff]   ;;  %559 = vmatprep.subr.bf16.mxu0 %v634_v0  ;;  %v639_v5 = vld [vmem:[%s847_s1 + $0xf0] sm:$0xff]   ;;  %v643_v9 = vld [vmem:[%s847_s1 + $0xe8] sm:$0xff]  }
   0x3   :  { %v636_v2 = vld [vmem:[%s847_s1 + $0x38] sm:$0xff]   ;;  %581 = vmatprep.subr.bf16.mxu1 %v635_v1  ;;  %v640_v6 = vld [vmem:[%s847_s1 + $0x30] sm:$0xff]   ;;  %v644_v10 = vld [vmem:[%s847_s1 + $0x28] sm:$0xff]  }
   0x4   :  { %v637_v3 = vld [vmem:[%s847_s1 + $0xb8] sm:$0xff]   ;;  %560 = vmatpush3.bf16.msra.mxu0 %v636_v2  ;;  %v641_v7 = vld [vmem:[%s847_s1 + $0xb0] sm:$0xff]   ;;  %v645_v11 = vld [vmem:[%s847_s1 + $0xa8] sm:$0xff]  }
   0x5   :  { %582 = vmatpush3.bf16.msra.mxu1 %v637_v3  ;;  %561 = vmatprep.subr.bf16.mxu0 %v638_v4  ;;  %v646_v12 = vld [vmem:[%s847_s1 + $0x60] sm:$0xff]   ;;  %v650_v16 = vld [vmem:[%s847_s1 + $0x58] sm:$0xff]   ;;  %v654_v20 = vld [vmem:[%s847_s1 + $0x50] sm:$0xff]  }
   0x6   :  { %583 = vmatprep.subr.bf16.mxu1 %v639_v5  ;;  %v647_v13 = vld [vmem:[%s847_s1 + $0xe0] sm:$0xff]   ;;  %v651_v17 = vld [vmem:[%s847_s1 + $0xd8] sm:$0xff]   ;;  %v655_v21 = vld [vmem:[%s847_s1 + $0xd0] sm:$0xff]  }
   0x7   :  { %v648_v14 = vld [vmem:[%s847_s1 + $0x20] sm:$0xff]   ;;  %v652_v18 = vld [vmem:[%s847_s1 + $0x18] sm:$0xff]   ;;  %v656_v22 = vld [vmem:[%s847_s1 + $0x10] sm:$0xff]  }
   0x8   :  { %562 = vmatpush3.bf16.msra.mxu0 %v640_v6  ;;  %v649_v15 = vld [vmem:[%s847_s1 + $0xa0] sm:$0xff]   ;;  %v653_v19 = vld [vmem:[%s847_s1 + $0x98] sm:$0xff]   ;;  %v657_v23 = vld [vmem:[%s847_s1 + $0x90] sm:$0xff]  }
   0x9   :  { %584 = vmatpush3.bf16.msra.mxu1 %v641_v7  ;;  %563 = vmatprep.subr.bf16.mxu0 %v642_v8  ;;  %v658_v24 = vld [vmem:[%s847_s1 + $0x48] sm:$0xff]   ;;  %v662_v28 = vld [vmem:[%s847_s1 + $0x40] sm:$0xff]   ;;  %v672_v37 = vld [vmem:[%s847_s1 + $0x138] sm:$0xff]  }
   0xa   :  { %585 = vmatprep.subr.bf16.mxu1 %v643_v9  ;;  %v659_v25 = vld [vmem:[%s847_s1 + $0xc8] sm:$0xff]   ;;  %v663_v29 = vld [vmem:[%s847_s1 + $0xc0] sm:$0xff]   ;;  %v673_v38 = vld [vmem:[%s847_s1 + $0x130] sm:$0xff]  }
   0xb   :  { %v660_v26 = vld [vmem:[%s847_s1 + $0x8] sm:$0xff]   ;;  %v664_v30 = vld [vmem:[%s847_s1] sm:$0xff]   ;;  %v676_v41 = vld [vmem:[%s847_s1 + $0x118] sm:$0xff]  }
   0xc   :  { %564 = vmatpush3.bf16.msra.mxu0 %v644_v10  ;;  %v661_v27 = vld [vmem:[%s847_s1 + $0x88] sm:$0xff]   ;;  %v665_v31 = vld [vmem:[%s847_s1 + $0x80] sm:$0xff]   ;;  %v677_v42 = vld [vmem:[%s847_s1 + $0x110] sm:$0xff]  }
   0xd   :  { %586 = vmatpush3.bf16.msra.mxu1 %v645_v11  ;;  %565 = vmatprep.subr.bf16.mxu0 %v646_v12  ;;  %v666_v32 = vld [vmem:[%s848_s0] ss:$20 sps:$4 sm:$0xff]   ;;  %v668_v33 = vld [vmem:[%s848_s0 + $0x4] ss:$20 sps:$4 sm:$0xff]   ;;  %v669_v35 = vld [vmem:[%s848_s0 + $0x8] ss:$20 sps:$4 sm:$0xff]  }
   0xe   :  { %587 = vmatprep.subr.bf16.mxu1 %v647_v13  ;;  %v671_v36 = vld [vmem:[%s848_s0 + $0xc] ss:$20 sps:$4 sm:$0xff]   ;;  %414 = vmatprep.mubr.bf16.mxu0 %v668_v33  ;;  %v680_v45 = vld [vmem:[%s848_s0 + $0x10] ss:$20 sps:$4 sm:$0xff]  }
   0xf   :  { %455 = vmatprep.mubr.bf16.mxu1 %v671_v36  ;;  %v674_v39 = vld [vmem:[%s847_s1 + $0x128] sm:$0xff]   ;;  %v675_v40 = vld [vmem:[%s847_s1 + $0x120] sm:$0xff]  }
  0x10   :  { %566 = vmatpush3.bf16.msra.mxu0 %v648_v14  ;;  %v678_v43 = vld [vmem:[%s847_s1 + $0x108] sm:$0xff]   ;;  %v679_v44 = vld [vmem:[%s847_s1 + $0x100] sm:$0xff]  }
  0x11   :  { %588 = vmatpush3.bf16.msra.mxu1 %v649_v15  ;;  %567 = vmatprep.subr.bf16.mxu0 %v650_v16  ;;  %v513_v59 = vld [vmem:[%s849_s2] ss:$0 sm:$0xff] }
  0x12   :  { %589 = vmatprep.subr.bf16.mxu1 %v651_v17 }
  0x14   :  { %568 = vmatpush3.bf16.msra.mxu0 %v652_v18 }
  0x15   :  { %590 = vmatpush3.bf16.msra.mxu1 %v653_v19  ;;  %569 = vmatprep.subr.bf16.mxu0 %v654_v20 }
  0x16   :  { %591 = vmatprep.subr.bf16.mxu1 %v655_v21 }
  0x18   :  { %570 = vmatpush3.bf16.msra.mxu0 %v656_v22 }
  0x19   :  { %592 = vmatpush3.bf16.msra.mxu1 %v657_v23  ;;  %571 = vmatprep.subr.bf16.mxu0 %v658_v24 }
  0x1a   :  { %593 = vmatprep.subr.bf16.mxu1 %v659_v25 }
  0x1c   :  { %572 = vmatpush3.bf16.msra.mxu0 %v660_v26 }
  0x1d   :  { %594 = vmatpush3.bf16.msra.mxu1 %v661_v27  ;;  %573 = vmatprep.subr.bf16.mxu0 %v662_v28 }
  0x1e   :  { %595 = vmatprep.subr.bf16.mxu1 %v663_v29 }
  0x20   :  { %574 = vmatpush3.bf16.msra.mxu0 %v664_v30 }
  0x21   :  { %596 = vmatpush3.bf16.msra.mxu1 %v665_v31  ;;  %612 = vmatprep.subr.bf16.mxu0 %v681_v34 }
  0x23   :  { %415 = vmatmul.mubr.bf16.vlgmr.msra.gmra.mxu0 %v666_v32 }
  0x24   :  { %456 = vmatmul.mubr.bf16.vlgmr.msra.gmra.mxu1 %v669_v35  ;;  %613 = vmatpush3.bf16.msra.mxu0 %v672_v37 }
  0x25   :  { %614 = vmatprep.subr.bf16.mxu0 %v681_v34  ;;  %628 = vmatprep.mubr.msk.bf16.mxu0 %vm682_vm0, %v681_v34 }
  0x28   :  { %615 = vmatpush3.bf16.msra.mxu0 %v673_v38 }
  0x29   :  { %616 = vmatprep.subr.bf16.mxu0 %v681_v34 }
  0x2c   :  { %617 = vmatpush3.bf16.msra.mxu0 %v674_v39 }
  0x2d   :  { %618 = vmatprep.subr.bf16.mxu0 %v681_v34 }
  0x30   :  { %619 = vmatpush3.bf16.msra.mxu0 %v675_v40 }
  0x31   :  { %620 = vmatprep.subr.bf16.mxu0 %v681_v34 }
  0x34   :  { %621 = vmatpush3.bf16.msra.mxu0 %v676_v41 }
  0x35   :  { %622 = vmatprep.subr.bf16.mxu0 %v681_v34 }
  0x38   :  { %623 = vmatpush3.bf16.msra.mxu0 %v677_v42 }
  0x39   :  { %624 = vmatprep.subr.bf16.mxu0 %v681_v34 }
  0x3c   :  { %625 = vmatpush3.bf16.msra.mxu0 %v678_v43 }
  0x3d   :  { %626 = vmatprep.subr.bf16.mxu0 %v681_v34 }
  0x40   :  { %627 = vmatpush3.bf16.msra.mxu0 %v679_v44 }
  0x43   :  { %629 = vmatmul.mubr.bf16.vlgmr.msra.gmra.mxu0 %v680_v45 }
  0xe3   :  { %v575_v46 = vpop.f32.mrf.mxu0 }
  0xe4   :  { %v597_v47 = vpop.f32.mrf.mxu1 }
  0xe5   :  { %v576_v48 = vpop.f32.mrf.mxu0 }
  0xe6   :  { %v598_v49 = vpop.f32.mrf.mxu1  ;;  %v577_v52 = vadd.f32 %v576_v48, %v575_v46 }
  0xe7   :  { %v578_v50 = vpop.f32.mrf.mxu0  ;;  %v599_v53 = vadd.f32 %v598_v49, %v597_v47 }
  0xe8   :  { %v600_v51 = vpop.f32.mrf.mxu1 }
  0xe9   :  { %v579_v54 = vpop.f32.mrf.mxu0  ;;  %v458_v58 = vadd.f32 %v599_v53, %v577_v52 }
  0xea   :  { %v601_v55 = vpop.f32.mrf.mxu1  ;;  %v580_v56 = vadd.f32 %v579_v54, %v578_v50 }
  0xeb   :  { %v602_v57 = vadd.f32 %v601_v55, %v600_v51 }
  0xed   :  { %v461_v0 = vadd.f32 %v602_v57, %v580_v56 }
 0x103   :  { %v498_v60 = vpop.f32.mrf.mxu0 }
 0x104   :  { %v499_v61 = vadd.f32 %v498_v60, %v458_v58 }
 0x105   :  { %v630_v62 = vpop.f32.mrf.mxu0 }
 0x106   :  { %v505_v63 = vadd.f32 %v513_v59, %v499_v61 }
 0x107   :  { %v501_v1 = vpop.f32.mrf.mxu0 }
 0x108   :  { %507 = vst [vmem:[%s850_s3] sm:$0xff] %v505_v63  ;;  %v502_v2 = vadd.f32 %v501_v1, %v461_v0 }
 0x109   :  { %v631_v3 = vpop.f32.mrf.mxu0 }
 0x10a   :  { %v506_v4 = vadd.f32 %v513_v59, %v502_v2 }
 0x10c   :  { %508 = vst [vmem:[%s850_s3 + $0x8] sm:$0xff] %v506_v4 }

</bundles_post_ra>
